<compile_context>
chip_gen: v6e
topology: v6e:2x2x1
jax: 0.10.0
libtpu: 0.0.40
codegen_flags: <defaults>
</compile_context>

<pallas_src>
import functools
import numpy as np

import jax
import jax.numpy as jnp
from jax.experimental import pallas as pl
from jax.experimental.pallas import tpu as pltpu

LN_EPS = 1e-5
DEFAULT_ROW_TILE = 256          # multiple of 8 and 128 -> MXU/lane friendly on v5e/v6e/v7x


def _gelu_exact(x):
    # PyTorch nn.GELU default (erf form)
    return 0.5 * x * (1.0 + jax.lax.erf(x * (2.0 ** -0.5)))


def _row_tile(R, row_tile):
    # Full-rows block when the array is small (allowed even if not a multiple of 8),
    # otherwise a multiple-of-8 row tile with standard partial edge blocks.
    return R if R <= row_tile else row_tile


# --------------------- fused skip-linear (concat fused) ----------------------
# y = x @ Wl + skip @ Wr + b   ==   Linear(2C -> C)(concat([x, skip], -1))

def _skip_linear_kernel(x_ref, s_ref, wl_ref, wr_ref, b_ref, o_ref):
    y = jnp.dot(x_ref[...], wl_ref[...], preferred_element_type=jnp.float32)
    y = y + jnp.dot(s_ref[...], wr_ref[...], preferred_element_type=jnp.float32)
    o_ref[...] = (y + b_ref[...].astype(jnp.float32)).astype(o_ref.dtype)


def skip_linear(x2d, s2d, wl, wr, b, *, row_tile=DEFAULT_ROW_TILE, vmem_limit_bytes=None):
    R, C = x2d.shape
    TR = _row_tile(R, row_tile)
    return pl.pallas_call(
        _skip_linear_kernel,
        out_shape=jax.ShapeDtypeStruct((R, C), x2d.dtype),
        grid=(pl.cdiv(R, TR),),
        in_specs=[
            pl.BlockSpec((TR, C), lambda i: (i, 0)),
            pl.BlockSpec((TR, C), lambda i: (i, 0)),
            pl.BlockSpec((C, C), lambda i: (0, 0)),     # weights: constant index_map -> resident
            pl.BlockSpec((C, C), lambda i: (0, 0)),
            pl.BlockSpec((1, C), lambda i: (0, 0)),
        ],
        out_specs=pl.BlockSpec((TR, C), lambda i: (i, 0)),
        compiler_params=pltpu.CompilerParams(
            dimension_semantics=("parallel",),
            vmem_limit_bytes=vmem_limit_bytes),
    )(x2d, s2d, wl, wr, b)


# ------------------ fused LayerNorm(norm2) + MLP + residual ------------------

def _ln_mlp_kernel(x_ref, g_ref, b_ref, w1_ref, b1_ref, w2_ref, b2_ref, o_ref):
    x = x_ref[...].astype(jnp.float32)
    mean = jnp.mean(x, axis=-1, keepdims=True)
    xc = x - mean
    var = jnp.mean(xc * xc, axis=-1, keepdims=True)
    xn = (xc * jax.lax.rsqrt(var + LN_EPS) * g_ref[...].astype(jnp.float32)
          + b_ref[...].astype(jnp.float32))
    h = jnp.dot(xn.astype(w1_ref.dtype), w1_ref[...], preferred_element_type=jnp.float32)
    h = _gelu_exact(h + b1_ref[...].astype(jnp.float32))
    y = jnp.dot(h.astype(w2_ref.dtype), w2_ref[...], preferred_element_type=jnp.float32)
    y = y + b2_ref[...].astype(jnp.float32)
    # Residual from the normalized activation, exactly as in the PyTorch module:
    #   x = self.norm2(x); x = x + self.drop_path(self.mlp(x))
    o_ref[...] = (xn + y).astype(o_ref.dtype)


def ln_mlp_residual(x2d, g, b, w1t, b1, w2t, b2, *, row_tile=DEFAULT_ROW_TILE,
                    vmem_limit_bytes=None):
    # TODO(synk): for production UViT sizes (dim~1152, hidden~4608) also K-tile the hidden
    # dim and pass vmem_limit_bytes (~48 MiB budget keeps v7x's 64 MiB VMEM happy).
    R, C = x2d.shape
    Hd = w1t.shape[1]
    TR = _row_tile(R, row_tile)
    return pl.pallas_call(
        _ln_mlp_kernel,
        out_shape=jax.ShapeDtypeStruct((R, C), x2d.dtype),
        grid=(pl.cdiv(R, TR),),
        in_specs=[
            pl.BlockSpec((TR, C), lambda i: (i, 0)),
            pl.BlockSpec((1, C), lambda i: (0, 0)),
            pl.BlockSpec((1, C), lambda i: (0, 0)),
            pl.BlockSpec((C, Hd), lambda i: (0, 0)),
            pl.BlockSpec((1, Hd), lambda i: (0, 0)),
            pl.BlockSpec((Hd, C), lambda i: (0, 0)),
            pl.BlockSpec((1, C), lambda i: (0, 0)),
        ],
        out_specs=pl.BlockSpec((TR, C), lambda i: (i, 0)),
        compiler_params=pltpu.CompilerParams(
            dimension_semantics=("parallel",),
            vmem_limit_bytes=vmem_limit_bytes),
    )(x2d, g, b, w1t, b1, w2t, b2)


# ---- fused LayerNorm(norm1) + windowed MHA + out-proj + residual (window-grouped) ----

def _window_attn_kernel(x_ref, g_ref, b_ref, wqkv_ref, bqkv_ref, wp_ref, bp_ref,
                        bias_ref, o_ref, ctx_ref, *, num_heads, head_dim):
    blk = x_ref.shape                         # (1, KW, N, C)
    KW, N, C = blk[1], blk[2], blk[3]
    M = KW * N
    hd = head_dim

    x_raw = x_ref[...].reshape(M, C).astype(jnp.float32)   # pre-norm tokens (residual source)

    # norm1 fused in-kernel (LayerNorm is per-token, so it commutes with roll/partition)
    mean = jnp.mean(x_raw, axis=-1, keepdims=True)
    xc = x_raw - mean
    var = jnp.mean(xc * xc, axis=-1, keepdims=True)
    xn = (xc * jax.lax.rsqrt(var + LN_EPS) * g_ref[...].astype(jnp.float32)
          + b_ref[...].astype(jnp.float32))

    # One fat QKV GEMM over all KW windows: (M, C) @ (C, 3C), f32 accumulation.
    # The q columns/bias are pre-scaled by head_dim**-0.5 at parameter-build time.
    w_dtype = wqkv_ref.dtype
    qkv = jnp.dot(xn.astype(w_dtype), wqkv_ref[...], preferred_element_type=jnp.float32)
    qkv = qkv + bqkv_ref[...].astype(jnp.float32)           # cols ordered (q|k|v) x (nh, hd)

    bias = bias_ref[...].astype(jnp.float32)                # (KW, nh, N, N)

    # Per-head attention (static unroll; windows are batched inside each dot_general).
    # Each head's context lands in the VMEM scratch at its (nh, hd) lane slice so the
    # output projection below runs as a single full-K GEMM.
    for h in range(num_heads):                              # static unroll over heads
        q = qkv[:, 0 * C + h * hd:0 * C + (h + 1) * hd].reshape(KW, N, hd)
        k = qkv[:, 1 * C + h * hd:1 * C + (h + 1) * hd].reshape(KW, N, hd)
        v = qkv[:, 2 * C + h * hd:2 * C + (h + 1) * hd].reshape(KW, N, hd)
        # batched over windows: (KW, N, hd) x (KW, N, hd) -> (KW, N, N)
        s = jax.lax.dot_general(q, k, (((2,), (2,)), ((0,), (0,))),
                                preferred_element_type=jnp.float32)
        s = s + bias[:, h]
        s = s - jnp.max(s, axis=-1, keepdims=True)
        p = jnp.exp(s)
        p = p * pl.reciprocal(jnp.sum(p, axis=-1, keepdims=True), approx=True)
        ctx = jax.lax.dot_general(p, v, (((2,), (1,)), ((0,), (0,))),
                                  preferred_element_type=jnp.float32)     # (KW, N, hd)
        ctx_ref[:, h * hd:(h + 1) * hd] = ctx.reshape(M, hd)

    # Single output-projection GEMM over all heads: (M, C) @ (C, C) (full K on the MXU).
    y = jnp.dot(ctx_ref[...].astype(wp_ref.dtype), wp_ref[...],
                preferred_element_type=jnp.float32)
    y = y + bp_ref[...].astype(jnp.float32)
    # Fused residual: roll/window_partition are token permutations, so adding the raw
    # (pre-norm) windowed input here == adding `shortcut` after window_reverse.
    o_ref[...] = (x_raw + y).reshape(blk).astype(o_ref.dtype)


def _pick_window_group(nW, N, max_rows=512):
    # Largest divisor of nW whose group has <= max_rows tokens (lane/sublane-denser blocks,
    # fewer grid steps; divisor so every block is exact).
    kw = 1
    for cand in range(1, nW + 1):
        if nW % cand == 0 and cand * N <= max_rows:
            kw = cand
    return kw


def window_attention(xw, norm1_g, norm1_b, wqkv_t, bqkv, wp_t, bp, attn_bias,
                     *, num_heads, head_dim, vmem_limit_bytes=None):
    B, nW, N, C = xw.shape
    KW = _pick_window_group(nW, N)
    kern = functools.partial(_window_attn_kernel, num_heads=num_heads, head_dim=head_dim)
    return pl.pallas_call(
        kern,
        out_shape=jax.ShapeDtypeStruct((B, nW, N, C), xw.dtype),
        grid=(B, nW // KW),
        in_specs=[
            pl.BlockSpec((1, KW, N, C), lambda bi, wi: (bi, wi, 0, 0)),
            pl.BlockSpec((1, C), lambda bi, wi: (0, 0)),
            pl.BlockSpec((1, C), lambda bi, wi: (0, 0)),
            pl.BlockSpec((C, 3 * C), lambda bi, wi: (0, 0)),
            pl.BlockSpec((1, 3 * C), lambda bi, wi: (0, 0)),
            pl.BlockSpec((C, C), lambda bi, wi: (0, 0)),
            pl.BlockSpec((1, C), lambda bi, wi: (0, 0)),
            pl.BlockSpec((KW, num_heads, N, N), lambda bi, wi: (wi, 0, 0, 0)),
        ],
        out_specs=pl.BlockSpec((1, KW, N, C), lambda bi, wi: (bi, wi, 0, 0)),
        scratch_shapes=[pltpu.VMEM((KW * N, C), jnp.float32)],   # head-context assembly buffer
        compiler_params=pltpu.CompilerParams(
            dimension_semantics=("parallel", "parallel"),   # no cross-window accumulation
            vmem_limit_bytes=vmem_limit_bytes),
    )(xw, norm1_g, norm1_b, wqkv_t, bqkv, wp_t, bp, attn_bias)


# ------------------------------ parameter setup ------------------------------
# Weights are pre-transposed / pre-reshaped ONCE here (no per-forward transposes),
# the q scale is folded into the QKV weight/bias once, and the relative-position bias
# (+ shift mask) is precomputed to (nW, nh, N, N).

def make_block_params(key, *, dim, input_resolution, num_heads, window_size=4,
                      shift_size=0, mlp_ratio=4.0, skip=False):
    H, W = input_resolution
    if min(input_resolution) <= window_size:
        shift_size = 0
        window_size = min(input_resolution)
    assert 0 <= shift_size < window_size
    hd = dim // num_heads
    hidden = int(dim * mlp_ratio)
    ks = jax.random.split(key, 12)

    def tn(k, shape, std=0.02):
        return std * jax.random.truncated_normal(k, -2.0, 2.0, shape, jnp.float32)

    # PyTorch-convention (out, in) weights, then transpose once.
    qkv_w = tn(ks[0], (3 * dim, dim)); qkv_b = tn(ks[1], (3 * dim,))
    proj_w = tn(ks[2], (dim, dim));    proj_b = tn(ks[3], (dim,))
    rpb_table = tn(ks[4], ((2 * window_size - 1) ** 2, num_heads))
    fc1_w = tn(ks[5], (hidden, dim));  fc1_b = tn(ks[6], (hidden,))
    fc2_w = tn(ks[7], (dim, hidden));  fc2_b = tn(ks[8], (dim,))

    # Fold the attention scale (head_dim**-0.5) into the q section of the QKV projection:
    # (x @ W + b) * s == x @ (s*W) + s*b.  NOTE: apply the same fold when importing
    # real PyTorch weights.
    scale = float(hd) ** (-0.5)
    col_scale = jnp.concatenate([jnp.full((dim,), scale, jnp.float32),
                                 jnp.ones((2 * dim,), jnp.float32)])
    qkv_wt = qkv_w.T * col_scale[None, :]        # (C, 3C), cols ordered (q|k|v) x (nh, hd)
    qkv_b = qkv_b * col_scale

    p = dict(
        cfg=dict(dim=dim, H=H, W=W, num_heads=num_heads, window_size=window_size,
                 shift_size=shift_size, head_dim=hd, hidden=hidden, skip=skip),
        norm1_g=jnp.ones((1, dim), jnp.float32),
        norm1_b=jnp.zeros((1, dim), jnp.float32),
        norm2_g=jnp.ones((1, dim), jnp.float32),
        norm2_b=jnp.zeros((1, dim), jnp.float32),
        qkv_wt=qkv_wt,
        qkv_b=qkv_b.reshape(1, 3 * dim),
        proj_wt=proj_w.T,                        # (C, C)
        proj_b=proj_b.reshape(1, dim),
        fc1_wt=fc1_w.T, fc1_b=fc1_b.reshape(1, hidden),
        fc2_wt=fc2_w.T, fc2_b=fc2_b.reshape(1, dim),
    )
    if skip:
        skip_w = tn(ks[9], (dim, 2 * dim)); skip_b = tn(ks[10], (dim,))
        p['skip_wl'] = skip_w[:, :dim].T         # multiplies x
        p['skip_wr'] = skip_w[:, dim:].T         # multiplies skip
        p['skip_b'] = skip_b.reshape(1, dim)

    # static relative_position_index buffer
    ws = window_size
    N = ws * ws
    coords = np.stack(np.meshgrid(np.arange(ws), np.arange(ws), indexing='ij'))
    cf = coords.reshape(2, -1)
    rel = (cf[:, :, None] - cf[:, None, :]).transpose(1, 2, 0).copy()
    rel[:, :, 0] += ws - 1
    rel[:, :, 1] += ws - 1
    rel[:, :, 0] *= 2 * ws - 1
    rp_index = jnp.asarray(rel.sum(-1), jnp.int32)            # (N, N)

    # shifted-window attention mask (zeros when shift_size == 0)
    nW = (H // ws) * (W // ws)
    if shift_size > 0:
        img_mask = np.zeros((1, H, W, 1), np.float32)
        slices = (slice(0, -ws), slice(-ws, -shift_size), slice(-shift_size, None))
        cnt = 0
        for hs in slices:
            for wsl in slices:
                img_mask[:, hs, wsl, :] = cnt
                cnt += 1
        mw = img_mask.reshape(1, H // ws, ws, W // ws, ws, 1)
        mw = mw.transpose(0, 1, 3, 2, 4, 5).reshape(-1, N)
        am = mw[:, None, :] - mw[:, :, None]
        attn_mask = jnp.asarray(np.where(am != 0, -100.0, 0.0).astype(np.float32))
    else:
        attn_mask = jnp.zeros((nW, N, N), jnp.float32)

    # precomputed per-window bias:  rel-pos-bias + shift mask  -> (nW, nh, N, N)
    rpb = rpb_table[rp_index.reshape(-1)].reshape(N, N, num_heads)
    rpb = jnp.transpose(rpb, (2, 0, 1))
    p['attn_bias'] = (rpb[None, :, :, :] + attn_mask[:, None, :, :]).astype(jnp.float32)
    return p


# --------------------------- forward (glue + kernels) ------------------------

def block_forward(p, x, skip=None):
    cfg = p['cfg']
    C = cfg['dim']; H, W = cfg['H'], cfg['W']
    nh = cfg['num_heads']; ws = cfg['window_size']; shift = cfg['shift_size']
    hd = cfg['head_dim']
    B, L, _ = x.shape
    assert L == H * W + 1

    # Block.skip_linear(concat([x, skip], -1)), concat fused into the kernel
    if cfg['skip'] and skip is not None:
        x = skip_linear(x.reshape(B * L, C), skip.reshape(B * L, C),
                        p['skip_wl'], p['skip_wr'], p['skip_b']).reshape(B, L, C)

    time_token = x[:, :1, :]
    img = x[:, 1:, :].reshape(B, H, W, C)          # raw (pre-norm); norm1 + residual fused

    if shift > 0:
        img = jnp.roll(img, shift=(-shift, -shift), axis=(1, 2))

    nW = (H // ws) * (W // ws)
    N = ws * ws

    # window_partition -> (B, nW, N, C)
    xw = img.reshape(B, H // ws, ws, W // ws, ws, C)
    xw = xw.transpose(0, 1, 3, 2, 4, 5).reshape(B, nW, N, C)

    # fused: norm1 -> windowed MHA (+bias/mask) -> out proj -> +residual
    aw = window_attention(xw, p['norm1_g'], p['norm1_b'], p['qkv_wt'], p['qkv_b'],
                          p['proj_wt'], p['proj_b'], p['attn_bias'],
                          num_heads=nh, head_dim=hd)

    # window_reverse
    ar = aw.reshape(B, H // ws, W // ws, ws, ws, C)
    ar = ar.transpose(0, 1, 3, 2, 4, 5).reshape(B, H, W, C)
    if shift > 0:
        ar = jnp.roll(ar, shift=(shift, shift), axis=(1, 2))
    img = ar.reshape(B, H * W, C)                  # == shortcut + attention output

    x = jnp.concatenate([time_token, img], axis=1)

    # fused: x = norm2(x); x = x + mlp(x)   (drop_path == Identity, drop=0)
    out = ln_mlp_residual(x.reshape(B * L, C), p['norm2_g'], p['norm2_b'],
                          p['fc1_wt'], p['fc1_b'], p['fc2_wt'], p['fc2_b'])
    return out.reshape(B, L, C)


# ------------------------------------ demo -----------------------------------

if __name__ == "__main__":
    key = jax.random.PRNGKey(0)
    dim, num_heads = 32, 4
    H = W = 8
    B = 2
    L = H * W + 1

    kp, kx, ks = jax.random.split(key, 3)
    params = make_block_params(kp, dim=dim, input_resolution=(H, W), num_heads=num_heads,
                               window_size=4, shift_size=0, mlp_ratio=4.0, skip=True)

    x = jax.random.normal(kx, (B, L, dim), jnp.float32)
    skip_in = jax.random.normal(ks, (B, L, dim), jnp.float32)

    out = jax.block_until_ready(block_forward(params, x, skip_in))

    assert out.shape == (B, L, dim), out.shape
    assert bool(jnp.all(jnp.isfinite(out)))
    # TODO(synk): dropout / DropPath / torch.utils.checkpoint are training-time no-ops here
    # (drop=0.0, inference), so they are intentionally omitted.
    print("KERNEL_OK")
</pallas_src>

<mosaic_0001>
module attributes {stable_mosaic.version = 11 : i64} {
  func.func @_skip_linear_kernel(%arg0: i32, %arg1: memref<130x32xf32, #tpu.memory_space<vmem>>, %arg2: memref<130x32xf32, #tpu.memory_space<vmem>>, %arg3: memref<32x32xf32, #tpu.memory_space<vmem>>, %arg4: memref<32x32xf32, #tpu.memory_space<vmem>>, %arg5: memref<1x32xf32, #tpu.memory_space<vmem>>, %arg6: memref<130x32xf32, #tpu.memory_space<vmem>>) attributes {dimension_semantics = [#tpu.dimension_semantics<parallel>], iteration_bounds = array<i64: 1>, scalar_prefetch = 0 : i64, scratch_operands = 0 : i64, tpu.core_type = #tpu.core_type<tc>, window_params = [{transform_indices = @transform_0, window_bounds = array<i64: 130, 32>}, {transform_indices = @transform_1, window_bounds = array<i64: 130, 32>}, {pipeline_mode = #tpu.pipeline_mode<synchronous>, transform_indices = @transform_2, window_bounds = array<i64: 32, 32>}, {pipeline_mode = #tpu.pipeline_mode<synchronous>, transform_indices = @transform_3, window_bounds = array<i64: 32, 32>}, {pipeline_mode = #tpu.pipeline_mode<synchronous>, transform_indices = @transform_4, window_bounds = array<i64: 1, 32>}, {transform_indices = @transform_5, window_bounds = array<i64: 130, 32>}]} {
    %c0 = arith.constant 0 : index
    %c0_0 = arith.constant 0 : index
    %0 = vector.load %arg1[%c0, %c0_0] : memref<130x32xf32, #tpu.memory_space<vmem>>, vector<130x32xf32>
    %c0_1 = arith.constant 0 : index
    %c0_2 = arith.constant 0 : index
    %1 = vector.load %arg3[%c0_1, %c0_2] : memref<32x32xf32, #tpu.memory_space<vmem>>, vector<32x32xf32>
    %cst = arith.constant dense<0.000000e+00> : vector<130x32xf32>
    %2 = tpu.matmul %0, %1, %cst {dimension_numbers = #tpu.dot_dimension_numbers<[1], [0], [0], [1], [0, 0, 1, 1], [], []>} : vector<130x32xf32>, vector<32x32xf32>, vector<130x32xf32> -> vector<130x32xf32>
    %c0_3 = arith.constant 0 : index
    %c0_4 = arith.constant 0 : index
    %3 = vector.load %arg2[%c0_3, %c0_4] : memref<130x32xf32, #tpu.memory_space<vmem>>, vector<130x32xf32>
    %c0_5 = arith.constant 0 : index
    %c0_6 = arith.constant 0 : index
    %4 = vector.load %arg4[%c0_5, %c0_6] : memref<32x32xf32, #tpu.memory_space<vmem>>, vector<32x32xf32>
    %cst_7 = arith.constant dense<0.000000e+00> : vector<130x32xf32>
    %5 = tpu.matmul %3, %4, %cst_7 {dimension_numbers = #tpu.dot_dimension_numbers<[1], [0], [0], [1], [0, 0, 1, 1], [], []>} : vector<130x32xf32>, vector<32x32xf32>, vector<130x32xf32> -> vector<130x32xf32>
    %6 = arith.addf %2, %5 : vector<130x32xf32>
    %c0_8 = arith.constant 0 : index
    %c0_9 = arith.constant 0 : index
    %7 = vector.load %arg5[%c0_8, %c0_9] : memref<1x32xf32, #tpu.memory_space<vmem>>, vector<1x32xf32>
    %8 = vector.broadcast %7 : vector<1x32xf32> to vector<130x32xf32>
    %9 = arith.addf %6, %8 : vector<130x32xf32>
    %c0_10 = arith.constant 0 : index
    %c0_11 = arith.constant 0 : index
    %10 = vector.load %arg6[%c0_10, %c0_11] : memref<130x32xf32, #tpu.memory_space<vmem>>, vector<130x32xf32>
    tpu.vector_store %arg6[%c0_10, %c0_11], %9 {strides = array<i32>} : memref<130x32xf32, #tpu.memory_space<vmem>>, vector<130x32xf32>,
    return
  }
  func.func @transform_0(%arg0: i32) -> (i32, i32) {
    %c0_i32 = arith.constant 0 : i32
    %c0_i32_0 = arith.constant 0 : i32
    return %arg0, %c0_i32 : i32, i32
  }
  func.func @transform_1(%arg0: i32) -> (i32, i32) {
    %c0_i32 = arith.constant 0 : i32
    %c0_i32_0 = arith.constant 0 : i32
    return %arg0, %c0_i32 : i32, i32
  }
  func.func @transform_2(%arg0: i32) -> (i32, i32) {
    %c0_i32 = arith.constant 0 : i32
    %c0_i32_0 = arith.constant 0 : i32
    %c0_i32_1 = arith.constant 0 : i32
    return %c0_i32, %c0_i32_0 : i32, i32
  }
  func.func @transform_3(%arg0: i32) -> (i32, i32) {
    %c0_i32 = arith.constant 0 : i32
    %c0_i32_0 = arith.constant 0 : i32
    %c0_i32_1 = arith.constant 0 : i32
    return %c0_i32, %c0_i32_0 : i32, i32
  }
  func.func @transform_4(%arg0: i32) -> (i32, i32) {
    %c0_i32 = arith.constant 0 : i32
    %c0_i32_0 = arith.constant 0 : i32
    %c0_i32_1 = arith.constant 0 : i32
    return %c0_i32, %c0_i32_0 : i32, i32
  }
  func.func @transform_5(%arg0: i32) -> (i32, i32) {
    %c0_i32 = arith.constant 0 : i32
    %c0_i32_0 = arith.constant 0 : i32
    return %arg0, %c0_i32 : i32, i32
  }
}

</mosaic_0001>

<bundles_post_ra>
// kernel: tpu_custom_call.1
= control target key start
LH: loop header
LB: loop body
LE: loop exit
PB: predicated region body
PF: predicated region fallthrough
CT: control target
= control target key end

     0   :  { %v708_v0 = vmov 0.0   ;;  %vm62_vm0 = vcmask 261120   ;;  %vm709_vm1 = vmmov 0   ;;  %vm505_vm2 = vcmask 254976   ;;  %s1065_s3 = inlined_call_operand.vmem [shape: f32[32,32], index: 3, kind: input, shape index: {}]   ;;  %s1066_s2 = inlined_call_operand.vmem [shape: f32[32,32], index: 2, kind: input, shape index: {}]   ;;  %s1067_s1 = inlined_call_operand.vmem [shape: f32[130,32], index: 1, kind: input, shape index: {}]   ;;  %s1068_s0 = inlined_call_operand.vmem [shape: f32[130,32], index: 0, kind: input, shape index: {}]   ;;  %s1069_s4 = inlined_call_operand.vmem [shape: f32[1,32], index: 4, kind: input, shape index: {}]   ;;  %s1070_s5 = inlined_call_operand.vmem [shape: f32[130,32], index: 5, kind: output, shape index: {}]  }
   0x1   :  { %588 = vmatprep.subr.mxu0 %v708_v0  ;;  %647 = vmatprep.subr.mxu1 %v708_v0  ;;  %v61_v1 = vld [vmem:[%s1065_s3 + $0x18] sm:$0xff]  ;;  %v60_v3 = vld [vmem:[%s1065_s3 + $0x10] sm:$0xff]  ;;  %v59_v5 = vld [vmem:[%s1065_s3 + $0x8] sm:$0xff] }
   0x2   :  { %v40_v2 = vld [vmem:[%s1066_s2 + $0x18] sm:$0xff]  ;;  %589 = vmatpush3.msra.mxu0 %v61_v1  ;;  %v39_v4 = vld [vmem:[%s1066_s2 + $0x10] sm:$0xff]  ;;  %v38_v6 = vld [vmem:[%s1066_s2 + $0x8] sm:$0xff]  ;;  %596 = vmatprep.mubr.msk.f32.mxu0 %vm709_vm1, %v708_v0 }
   0x3   :  { %648 = vmatpush3.msra.mxu1 %v40_v2  ;;  %590 = vmatprep.subr.mxu0 %v708_v0  ;;  %v58_v7 = vld [vmem:[%s1065_s3] sm:$0xff]  ;;  %v42_v11 = vld [vmem:[%s1067_s1 + $0x8] sm:$0xff]  ;;  %v43_v13 = vld [vmem:[%s1067_s1 + $0x10] sm:$0xff] }
   0x4   :  { %649 = vmatprep.subr.mxu1 %v708_v0  ;;  %591 = vmatpush3.msra.mxu0 %v60_v3  ;;  %v37_v8 = vld [vmem:[%s1066_s2] sm:$0xff]  ;;  %v21_v12 = vld [vmem:[%s1068_s0 + $0x8] sm:$0xff]  ;;  %v22_v14 = vld [vmem:[%s1068_s0 + $0x10] sm:$0xff] }
   0x5   :  { %650 = vmatpush3.msra.mxu1 %v39_v4  ;;  %592 = vmatprep.subr.mxu0 %v708_v0  ;;  %v41_v9 = vld [vmem:[%s1067_s1] sm:$0xff]  ;;  %v44_v15 = vld [vmem:[%s1067_s1 + $0x18] sm:$0xff]  ;;  %v46_v19 = vld [vmem:[%s1067_s1 + $0x28] sm:$0xff] }
   0x6   :  { %651 = vmatprep.subr.mxu1 %v708_v0  ;;  %593 = vmatpush3.msra.mxu0 %v59_v5  ;;  %v20_v10 = vld [vmem:[%s1068_s0] sm:$0xff]  ;;  %v23_v16 = vld [vmem:[%s1068_s0 + $0x18] sm:$0xff]  ;;  %v25_v20 = vld [vmem:[%s1068_s0 + $0x28] sm:$0xff] }
   0x7   :  { %652 = vmatpush3.msra.mxu1 %v38_v6  ;;  %594 = vmatprep.subr.mxu0 %v708_v0  ;;  %v45_v17 = vld [vmem:[%s1067_s1 + $0x20] sm:$0xff]  ;;  %v47_v21 = vld [vmem:[%s1067_s1 + $0x30] sm:$0xff]  ;;  %v48_v23 = vld [vmem:[%s1067_s1 + $0x38] sm:$0xff] }
   0x8   :  { %653 = vmatprep.subr.mxu1 %v708_v0  ;;  %595 = vmatpush3.msra.mxu0 %v58_v7  ;;  %v24_v18 = vld [vmem:[%s1068_s0 + $0x20] sm:$0xff]  ;;  %v26_v22 = vld [vmem:[%s1068_s0 + $0x30] sm:$0xff]  ;;  %v27_v24 = vld [vmem:[%s1068_s0 + $0x38] sm:$0xff] }
   0x9   :  { %654 = vmatpush3.msra.mxu1 %v37_v8  ;;  %655 = vmatprep.mubr.msk.f32.mxu1 %vm709_vm1, %v708_v0  ;;  %v49_v25 = vld [vmem:[%s1067_s1 + $0x40] sm:$0xff]  ;;  %v50_v27 = vld [vmem:[%s1067_s1 + $0x48] sm:$0xff]  ;;  %v51_v29 = vld [vmem:[%s1067_s1 + $0x50] sm:$0xff] }
   0xa   :  { %597 = vmatmul.mubr.msk.f32.vlgmr.msra.gmra.mxu0 %vm62_vm0, %v41_v9  ;;  %656 = vmatmul.mubr.msk.f32.vlgmr.msra.gmra.mxu1 %vm62_vm0, %v20_v10  ;;  %v28_v26 = vld [vmem:[%s1068_s0 + $0x40] sm:$0xff]  ;;  %v29_v28 = vld [vmem:[%s1068_s0 + $0x48] sm:$0xff]  ;;  %v30_v30 = vld [vmem:[%s1068_s0 + $0x50] sm:$0xff] }
   0xb   :  { %599 = vmatprep.mubr.msk.f32.mxu0 %vm709_vm1, %v708_v0  ;;  %658 = vmatprep.mubr.msk.f32.mxu1 %vm709_vm1, %v708_v0  ;;  %v52_v31 = vld [vmem:[%s1067_s1 + $0x58] sm:$0xff]  ;;  %v53_v33 = vld [vmem:[%s1067_s1 + $0x60] sm:$0xff]  ;;  %v54_v35 = vld [vmem:[%s1067_s1 + $0x68] sm:$0xff] }
   0xc   :  { %v31_v32 = vld [vmem:[%s1068_s0 + $0x58] sm:$0xff]  ;;  %v32_v34 = vld [vmem:[%s1068_s0 + $0x60] sm:$0xff]  ;;  %v33_v36 = vld [vmem:[%s1068_s0 + $0x68] sm:$0xff] }
   0xd   :  { %v55_v37 = vld [vmem:[%s1067_s1 + $0x70] sm:$0xff]  ;;  %v56_v39 = vld [vmem:[%s1067_s1 + $0x78] sm:$0xff]  ;;  %v57_v41 = vld [vmem:[%s1067_s1 + $0x80] sm:$0x3] }
   0xe   :  { %600 = vmatmul.mubr.msk.f32.gmra.mxu0 %vm62_vm0, %v42_v11  ;;  %659 = vmatmul.mubr.msk.f32.gmra.mxu1 %vm62_vm0, %v21_v12  ;;  %v34_v38 = vld [vmem:[%s1068_s0 + $0x70] sm:$0xff]  ;;  %v35_v40 = vld [vmem:[%s1068_s0 + $0x78] sm:$0xff]  ;;  %v36_v42 = vld [vmem:[%s1068_s0 + $0x80] sm:$0x3] }
   0xf   :  { %602 = vmatprep.mubr.msk.f32.mxu0 %vm709_vm1, %v708_v0  ;;  %661 = vmatprep.mubr.msk.f32.mxu1 %vm709_vm1, %v708_v0  ;;  %v979_v45 = vld [vmem:[%s1069_s4] ss:$0 sm:$0xff] }
  0x12   :  { %603 = vmatmul.mubr.msk.f32.gmra.mxu0 %vm62_vm0, %v43_v13  ;;  %662 = vmatmul.mubr.msk.f32.gmra.mxu1 %vm62_vm0, %v22_v14 }
  0x13   :  { %605 = vmatprep.mubr.msk.f32.mxu0 %vm709_vm1, %v708_v0  ;;  %664 = vmatprep.mubr.msk.f32.mxu1 %vm709_vm1, %v708_v0 }
  0x16   :  { %606 = vmatmul.mubr.msk.f32.gmra.mxu0 %vm62_vm0, %v44_v15  ;;  %665 = vmatmul.mubr.msk.f32.gmra.mxu1 %vm62_vm0, %v23_v16 }
  0x17   :  { %608 = vmatprep.mubr.msk.f32.mxu0 %vm709_vm1, %v708_v0  ;;  %667 = vmatprep.mubr.msk.f32.mxu1 %vm709_vm1, %v708_v0 }
  0x1a   :  { %609 = vmatmul.mubr.msk.f32.gmra.mxu0 %vm62_vm0, %v45_v17  ;;  %668 = vmatmul.mubr.msk.f32.gmra.mxu1 %vm62_vm0, %v24_v18 }
  0x1b   :  { %611 = vmatprep.mubr.msk.f32.mxu0 %vm709_vm1, %v708_v0  ;;  %670 = vmatprep.mubr.msk.f32.mxu1 %vm709_vm1, %v708_v0 }
  0x1e   :  { %612 = vmatmul.mubr.msk.f32.gmra.mxu0 %vm62_vm0, %v46_v19  ;;  %671 = vmatmul.mubr.msk.f32.gmra.mxu1 %vm62_vm0, %v25_v20 }
  0x1f   :  { %614 = vmatprep.mubr.msk.f32.mxu0 %vm709_vm1, %v708_v0  ;;  %673 = vmatprep.mubr.msk.f32.mxu1 %vm709_vm1, %v708_v0 }
  0x22   :  { %615 = vmatmul.mubr.msk.f32.gmra.mxu0 %vm62_vm0, %v47_v21  ;;  %674 = vmatmul.mubr.msk.f32.gmra.mxu1 %vm62_vm0, %v26_v22 }
  0x23   :  { %617 = vmatprep.mubr.msk.f32.mxu0 %vm709_vm1, %v708_v0  ;;  %676 = vmatprep.mubr.msk.f32.mxu1 %vm709_vm1, %v708_v0 }
  0x26   :  { %618 = vmatmul.mubr.msk.f32.gmra.mxu0 %vm62_vm0, %v48_v23  ;;  %677 = vmatmul.mubr.msk.f32.gmra.mxu1 %vm62_vm0, %v27_v24 }
  0x27   :  { %620 = vmatprep.mubr.msk.f32.mxu0 %vm709_vm1, %v708_v0  ;;  %679 = vmatprep.mubr.msk.f32.mxu1 %vm709_vm1, %v708_v0 }
  0x2a   :  { %621 = vmatmul.mubr.msk.f32.gmra.mxu0 %vm62_vm0, %v49_v25  ;;  %680 = vmatmul.mubr.msk.f32.gmra.mxu1 %vm62_vm0, %v28_v26 }
  0x2b   :  { %623 = vmatprep.mubr.msk.f32.mxu0 %vm709_vm1, %v708_v0  ;;  %682 = vmatprep.mubr.msk.f32.mxu1 %vm709_vm1, %v708_v0 }
  0x2e   :  { %624 = vmatmul.mubr.msk.f32.gmra.mxu0 %vm62_vm0, %v50_v27  ;;  %683 = vmatmul.mubr.msk.f32.gmra.mxu1 %vm62_vm0, %v29_v28 }
  0x2f   :  { %626 = vmatprep.mubr.msk.f32.mxu0 %vm709_vm1, %v708_v0  ;;  %685 = vmatprep.mubr.msk.f32.mxu1 %vm709_vm1, %v708_v0 }
  0x32   :  { %627 = vmatmul.mubr.msk.f32.gmra.mxu0 %vm62_vm0, %v51_v29  ;;  %686 = vmatmul.mubr.msk.f32.gmra.mxu1 %vm62_vm0, %v30_v30 }
  0x33   :  { %629 = vmatprep.mubr.msk.f32.mxu0 %vm709_vm1, %v708_v0  ;;  %688 = vmatprep.mubr.msk.f32.mxu1 %vm709_vm1, %v708_v0 }
  0x36   :  { %630 = vmatmul.mubr.msk.f32.gmra.mxu0 %vm62_vm0, %v52_v31  ;;  %689 = vmatmul.mubr.msk.f32.gmra.mxu1 %vm62_vm0, %v31_v32 }
  0x37   :  { %632 = vmatprep.mubr.msk.f32.mxu0 %vm709_vm1, %v708_v0  ;;  %691 = vmatprep.mubr.msk.f32.mxu1 %vm709_vm1, %v708_v0 }
  0x3a   :  { %633 = vmatmul.mubr.msk.f32.gmra.mxu0 %vm62_vm0, %v53_v33  ;;  %692 = vmatmul.mubr.msk.f32.gmra.mxu1 %vm62_vm0, %v32_v34 }
  0x3b   :  { %635 = vmatprep.mubr.msk.f32.mxu0 %vm709_vm1, %v708_v0  ;;  %694 = vmatprep.mubr.msk.f32.mxu1 %vm709_vm1, %v708_v0 }
  0x3e   :  { %636 = vmatmul.mubr.msk.f32.gmra.mxu0 %vm62_vm0, %v54_v35  ;;  %695 = vmatmul.mubr.msk.f32.gmra.mxu1 %vm62_vm0, %v33_v36 }
  0x3f   :  { %638 = vmatprep.mubr.msk.f32.mxu0 %vm709_vm1, %v708_v0  ;;  %697 = vmatprep.mubr.msk.f32.mxu1 %vm709_vm1, %v708_v0 }
  0x42   :  { %639 = vmatmul.mubr.msk.f32.gmra.mxu0 %vm62_vm0, %v55_v37  ;;  %698 = vmatmul.mubr.msk.f32.gmra.mxu1 %vm62_vm0, %v34_v38 }
  0x43   :  { %641 = vmatprep.mubr.msk.f32.mxu0 %vm709_vm1, %v708_v0  ;;  %700 = vmatprep.mubr.msk.f32.mxu1 %vm709_vm1, %v708_v0 }
  0x46   :  { %642 = vmatmul.mubr.msk.f32.gmra.mxu0 %vm62_vm0, %v56_v39  ;;  %701 = vmatmul.mubr.msk.f32.gmra.mxu1 %vm62_vm0, %v35_v40 }
  0x47   :  { %644 = vmatprep.mubr.msk.f32.mxu0 %vm709_vm1, %v708_v0  ;;  %703 = vmatprep.mubr.msk.f32.mxu1 %vm709_vm1, %v708_v0 }
  0x4a   :  { %645 = vmatmul.mubr.msk.f32.gmra.mxu0 %vm62_vm0, %v57_v41  ;;  %704 = vmatmul.mubr.msk.f32.gmra.mxu1 %vm62_vm0, %v36_v42 }
  0xca   :  { %v180_v43 = vpop.f32.mrf.mxu0  ;;  %v381_v44 = vpop.f32.mrf.mxu1 }
  0xcb   :  { %v382_v46 = vadd.f32 %v381_v44, %v180_v43 }
  0xcc   :  { %v598_v47 = vpop.f32.mrf.mxu0  ;;  %v657_v48 = vpop.f32.mrf.mxu1 }
  0xcd   :  { %v472_v49 = vadd.f32 %v979_v45, %v382_v46 }
  0xce   :  { %v185_v50 = vpop.f32.mrf.mxu0  ;;  %v386_v51 = vpop.f32.mrf.mxu1 }
  0xcf   :  { %489 = vst.msk [vmem:[%s1070_s5] sm:$0xff] %vm62_vm0, %v472_v49  ;;  %v387_v52 = vadd.f32 %v386_v51, %v185_v50 }
  0xd0   :  { %v601_v53 = vpop.f32.mrf.mxu0  ;;  %v660_v54 = vpop.f32.mrf.mxu1 }
  0xd1   :  { %v473_v55 = vadd.f32 %v979_v45, %v387_v52 }
  0xd2   :  { %v190_v56 = vpop.f32.mrf.mxu0  ;;  %v391_v57 = vpop.f32.mrf.mxu1 }
  0xd3   :  { %490 = vst.msk [vmem:[%s1070_s5 + $0x8] sm:$0xff] %vm62_vm0, %v473_v55  ;;  %v392_v58 = vadd.f32 %v391_v57, %v190_v56 }
  0xd4   :  { %v604_v59 = vpop.f32.mrf.mxu0  ;;  %v663_v60 = vpop.f32.mrf.mxu1 }
  0xd5   :  { %v474_v61 = vadd.f32 %v979_v45, %v392_v58 }
  0xd6   :  { %v195_v62 = vpop.f32.mrf.mxu0  ;;  %v396_v63 = vpop.f32.mrf.mxu1 }
  0xd7   :  { %491 = vst.msk [vmem:[%s1070_s5 + $0x10] sm:$0xff] %vm62_vm0, %v474_v61  ;;  %v397_v0 = vadd.f32 %v396_v63, %v195_v62 }
  0xd8   :  { %v607_v1 = vpop.f32.mrf.mxu0  ;;  %v666_v2 = vpop.f32.mrf.mxu1 }
  0xd9   :  { %v475_v3 = vadd.f32 %v979_v45, %v397_v0 }
  0xda   :  { %v200_v4 = vpop.f32.mrf.mxu0  ;;  %v401_v5 = vpop.f32.mrf.mxu1 }
  0xdb   :  { %492 = vst.msk [vmem:[%s1070_s5 + $0x18] sm:$0xff] %vm62_vm0, %v475_v3  ;;  %v402_v6 = vadd.f32 %v401_v5, %v200_v4 }
  0xdc   :  { %v610_v7 = vpop.f32.mrf.mxu0  ;;  %v669_v8 = vpop.f32.mrf.mxu1 }
  0xdd   :  { %v476_v9 = vadd.f32 %v979_v45, %v402_v6 }
  0xde   :  { %v205_v10 = vpop.f32.mrf.mxu0  ;;  %v406_v11 = vpop.f32.mrf.mxu1 }
  0xdf   :  { %493 = vst.msk [vmem:[%s1070_s5 + $0x20] sm:$0xff] %vm62_vm0, %v476_v9  ;;  %v407_v12 = vadd.f32 %v406_v11, %v205_v10 }
  0xe0   :  { %v613_v13 = vpop.f32.mrf.mxu0  ;;  %v672_v14 = vpop.f32.mrf.mxu1 }
  0xe1   :  { %v477_v15 = vadd.f32 %v979_v45, %v407_v12 }
  0xe2   :  { %v210_v16 = vpop.f32.mrf.mxu0  ;;  %v411_v17 = vpop.f32.mrf.mxu1 }
  0xe3   :  { %494 = vst.msk [vmem:[%s1070_s5 + $0x28] sm:$0xff] %vm62_vm0, %v477_v15  ;;  %v412_v18 = vadd.f32 %v411_v17, %v210_v16 }
  0xe4   :  { %v616_v19 = vpop.f32.mrf.mxu0  ;;  %v675_v20 = vpop.f32.mrf.mxu1 }
  0xe5   :  { %v478_v21 = vadd.f32 %v979_v45, %v412_v18 }
  0xe6   :  { %v215_v22 = vpop.f32.mrf.mxu0  ;;  %v416_v23 = vpop.f32.mrf.mxu1 }
  0xe7   :  { %495 = vst.msk [vmem:[%s1070_s5 + $0x30] sm:$0xff] %vm62_vm0, %v478_v21  ;;  %v417_v24 = vadd.f32 %v416_v23, %v215_v22 }
  0xe8   :  { %v619_v25 = vpop.f32.mrf.mxu0  ;;  %v678_v26 = vpop.f32.mrf.mxu1 }
  0xe9   :  { %v479_v27 = vadd.f32 %v979_v45, %v417_v24 }
  0xea   :  { %v220_v28 = vpop.f32.mrf.mxu0  ;;  %v421_v29 = vpop.f32.mrf.mxu1 }
  0xeb   :  { %496 = vst.msk [vmem:[%s1070_s5 + $0x38] sm:$0xff] %vm62_vm0, %v479_v27  ;;  %v422_v30 = vadd.f32 %v421_v29, %v220_v28 }
  0xec   :  { %v622_v31 = vpop.f32.mrf.mxu0  ;;  %v681_v32 = vpop.f32.mrf.mxu1 }
  0xed   :  { %v480_v33 = vadd.f32 %v979_v45, %v422_v30 }
  0xee   :  { %v225_v34 = vpop.f32.mrf.mxu0  ;;  %v426_v35 = vpop.f32.mrf.mxu1 }
  0xef   :  { %497 = vst.msk [vmem:[%s1070_s5 + $0x40] sm:$0xff] %vm62_vm0, %v480_v33  ;;  %v427_v36 = vadd.f32 %v426_v35, %v225_v34 }
  0xf0   :  { %v625_v37 = vpop.f32.mrf.mxu0  ;;  %v684_v38 = vpop.f32.mrf.mxu1 }
  0xf1   :  { %v481_v39 = vadd.f32 %v979_v45, %v427_v36 }
  0xf2   :  { %v230_v40 = vpop.f32.mrf.mxu0  ;;  %v431_v41 = vpop.f32.mrf.mxu1 }
  0xf3   :  { %498 = vst.msk [vmem:[%s1070_s5 + $0x48] sm:$0xff] %vm62_vm0, %v481_v39  ;;  %v432_v42 = vadd.f32 %v431_v41, %v230_v40 }
  0xf4   :  { %v628_v43 = vpop.f32.mrf.mxu0  ;;  %v687_v44 = vpop.f32.mrf.mxu1 }
  0xf5   :  { %v482_v46 = vadd.f32 %v979_v45, %v432_v42 }
  0xf6   :  { %v235_v47 = vpop.f32.mrf.mxu0  ;;  %v436_v48 = vpop.f32.mrf.mxu1 }
  0xf7   :  { %499 = vst.msk [vmem:[%s1070_s5 + $0x50] sm:$0xff] %vm62_vm0, %v482_v46  ;;  %v437_v49 = vadd.f32 %v436_v48, %v235_v47 }
  0xf8   :  { %v631_v50 = vpop.f32.mrf.mxu0  ;;  %v690_v51 = vpop.f32.mrf.mxu1 }
  0xf9   :  { %v483_v52 = vadd.f32 %v979_v45, %v437_v49 }
  0xfa   :  { %v240_v53 = vpop.f32.mrf.mxu0  ;;  %v441_v54 = vpop.f32.mrf.mxu1 }
  0xfb   :  { %500 = vst.msk [vmem:[%s1070_s5 + $0x58] sm:$0xff] %vm62_vm0, %v483_v52  ;;  %v442_v55 = vadd.f32 %v441_v54, %v240_v53 }
  0xfc   :  { %v634_v56 = vpop.f32.mrf.mxu0  ;;  %v693_v57 = vpop.f32.mrf.mxu1 }
  0xfd   :  { %v484_v58 = vadd.f32 %v979_v45, %v442_v55 }
  0xfe   :  { %v245_v59 = vpop.f32.mrf.mxu0  ;;  %v446_v60 = vpop.f32.mrf.mxu1 }
  0xff   :  { %501 = vst.msk [vmem:[%s1070_s5 + $0x60] sm:$0xff] %vm62_vm0, %v484_v58  ;;  %v447_v61 = vadd.f32 %v446_v60, %v245_v59 }
 0x100   :  { %v637_v62 = vpop.f32.mrf.mxu0  ;;  %v696_v63 = vpop.f32.mrf.mxu1 }
 0x101   :  { %v485_v0 = vadd.f32 %v979_v45, %v447_v61 }
 0x102   :  { %v250_v1 = vpop.f32.mrf.mxu0  ;;  %v451_v2 = vpop.f32.mrf.mxu1 }
 0x103   :  { %502 = vst.msk [vmem:[%s1070_s5 + $0x68] sm:$0xff] %vm62_vm0, %v485_v0  ;;  %v452_v3 = vadd.f32 %v451_v2, %v250_v1 }
 0x104   :  { %v640_v4 = vpop.f32.mrf.mxu0  ;;  %v699_v5 = vpop.f32.mrf.mxu1 }
 0x105   :  { %v486_v6 = vadd.f32 %v979_v45, %v452_v3 }
 0x106   :  { %v255_v7 = vpop.f32.mrf.mxu0  ;;  %v456_v8 = vpop.f32.mrf.mxu1 }
 0x107   :  { %503 = vst.msk [vmem:[%s1070_s5 + $0x70] sm:$0xff] %vm62_vm0, %v486_v6  ;;  %v457_v9 = vadd.f32 %v456_v8, %v255_v7 }
 0x108   :  { %v643_v10 = vpop.f32.mrf.mxu0  ;;  %v702_v11 = vpop.f32.mrf.mxu1 }
 0x109   :  { %v487_v12 = vadd.f32 %v979_v45, %v457_v9 }
 0x10a   :  { %v260_v13 = vpop.f32.mrf.mxu0  ;;  %v461_v14 = vpop.f32.mrf.mxu1 }
 0x10b   :  { %504 = vst.msk [vmem:[%s1070_s5 + $0x78] sm:$0xff] %vm62_vm0, %v487_v12  ;;  %v462_v15 = vadd.f32 %v461_v14, %v260_v13 }
 0x10c   :  { %v646_v16 = vpop.f32.mrf.mxu0  ;;  %v705_v17 = vpop.f32.mrf.mxu1 }
 0x10d   :  { %v488_v18 = vadd.f32 %v979_v45, %v462_v15 }
 0x10f   :  { %506 = vst.msk [vmem:[%s1070_s5 + $0x80] sm:$0x3] %vm505_vm2, %v488_v18 }

</bundles_post_ra>
